<compile_context>
chip_gen: v7x
topology: tpu7x:2x2x1
jax: 0.10.0
libtpu: 0.0.40
codegen_flags: <defaults>
</compile_context>

<pallas_src>
import jax
import jax.numpy as jnp
from jax import lax
from jax.experimental import pallas as pl
from jax.experimental.pallas import tpu as pltpu


def _aux_regressor_kernel(x_ref, wt_ref, b_ref, o_ref):
    # y[b, o] = sum_k x[b, k] * wt[k, o]  -- MXU, f32 accumulation, no transpose needed.
    y = jnp.dot(x_ref[...], wt_ref[...],
                preferred_element_type=jnp.float32,
                precision=lax.Precision.HIGHEST)
    y = y + b_ref[...]                      # [TB, D_out] + [1, D_out]
    y = jnp.clip(y, 0.0, 1.0)
    # L1 normalize along features; y >= 0 after the clip, so abs() is redundant.
    denom = jnp.maximum(jnp.sum(y, axis=1, keepdims=True), 1e-12)
    o_ref[...] = (y * pl.reciprocal(denom, approx=False)).astype(o_ref.dtype)


def _round_down(n, m):
    return (n // m) * m


def _num_tensorcores():
    """Best-effort TensorCores per chip (2 on v7x, 1 on v5e/v6e). Falls back to 1."""
    try:
        info = pltpu.get_tpu_info()
        for name in ("num_cores", "core_count", "num_tensorcores", "tensor_cores"):
            v = getattr(info, name, None)
            if isinstance(v, int) and v >= 1:
                return v
    except Exception:
        pass
    try:
        v = getattr(jax.devices()[0], "num_cores", None)
        if isinstance(v, int) and v >= 1:
            return v
    except Exception:
        pass
    return 1


def prepare_params(weight, bias):
    """One-time (parameter-load-time) prep.

    Transposes the PyTorch-layout weight [D_out, D_in] -> [D_in, D_out] so the
    resident weight feeds the MXU without any per-step shuffle, and stages the
    bias as an f32 [1, D_out] row for direct broadcast in the kernel.
    """
    w_t = jnp.asarray(weight, jnp.float32).T
    b_row = jnp.asarray(bias, jnp.float32).reshape(1, -1)
    return w_t, b_row


def _run_tiles(x, w_t, b_row, tb, rows, out_dtype):
    """One pallas_call over the first `rows` rows of x, tiled by `tb` (tb divides rows)."""
    _, d_in = x.shape
    d_out = w_t.shape[1]
    grid = (rows // tb,)
    cost = pl.CostEstimate(
        flops=2 * rows * d_in * d_out,
        transcendentals=0,
        bytes_accessed=(rows * d_in * x.dtype.itemsize
                        + rows * d_out * jnp.dtype(out_dtype).itemsize
                        + int(w_t.size) * w_t.dtype.itemsize
                        + int(b_row.size) * b_row.dtype.itemsize),
    )
    return pl.pallas_call(
        _aux_regressor_kernel,
        out_shape=jax.ShapeDtypeStruct((rows, d_out), out_dtype),
        grid=grid,
        in_specs=[
            pl.BlockSpec((tb, d_in), lambda i: (i, 0)),      # streamed batch tile
            pl.BlockSpec((d_in, d_out), lambda i: (0, 0)),   # VMEM-resident weight
            pl.BlockSpec((1, d_out), lambda i: (0, 0)),      # VMEM-resident bias
        ],
        out_specs=pl.BlockSpec((tb, d_out), lambda i: (i, 0)),
        compiler_params=pltpu.CompilerParams(
            dimension_semantics=("parallel",),   # v7x: shard batch tiles across the 2 TCs
            vmem_limit_bytes=32 * 1024 * 1024,
        ),
        cost_estimate=cost,
    )(x, w_t, b_row)


def aux_regressor_linear(x, w_t, b_row, *, block_b=4096, out_dtype=jnp.float32,
                         min_grid_steps=None):
    """x: [B, D_in]; (w_t, b_row) from prepare_params(). Returns [B, D_out]."""
    B, d_in = x.shape
    assert w_t.shape[0] == d_in, "weight must be pre-transposed via prepare_params"
    align = 16  # sublane-safe for both f32 and bf16 tiles

    if min_grid_steps is None:
        min_grid_steps = _num_tensorcores()

    # Tile: largest multiple of `align` <= block_b, capped so the batch grid has at
    # least `min_grid_steps` steps when the batch is large enough (v7x megacore).
    tb = max(align, _round_down(block_b, align))
    if min_grid_steps > 1 and B >= min_grid_steps * align:
        tb = min(tb, max(align, _round_down(B // min_grid_steps, align)))

    if B <= tb:
        # Whole batch in one block: block shape == full array dims (always legal),
        # no padding, no copies.
        return _run_tiles(x, w_t, b_row, B, B, out_dtype)

    b_main = _round_down(B, tb)
    out_main = _run_tiles(x, w_t, b_row, tb, b_main, out_dtype)
    if b_main == B:
        return out_main
    # Ragged tail: tiny second call on the last (B - b_main) rows only (block ==
    # full dims), instead of re-materializing/padding all of x to a tile multiple.
    x_tail = lax.dynamic_slice_in_dim(x, b_main, B - b_main, axis=0)
    out_tail = _run_tiles(x_tail, w_t, b_row, B - b_main, B - b_main, out_dtype)
    return jnp.concatenate([out_main, out_tail], axis=0)


def _reference(x, weight, bias):
    y = jnp.dot(x, weight.T, precision=lax.Precision.HIGHEST) + bias
    y = jnp.clip(y, 0.0, 1.0)
    denom = jnp.maximum(jnp.sum(jnp.abs(y), axis=1, keepdims=True), 1e-12)
    return y / denom


if __name__ == "__main__":
    key = jax.random.PRNGKey(0)
    k_x, k_w, k_b, k_x2, k_x3 = jax.random.split(key, 5)

    input_size, output_size = 32, 16
    bound = 1.0 / (input_size ** 0.5)
    weight = jax.random.uniform(k_w, (output_size, input_size),
                                minval=-bound, maxval=bound, dtype=jnp.float32)
    bias = jax.random.uniform(k_b, (output_size,),
                              minval=-bound, maxval=bound, dtype=jnp.float32)
    w_t, b_row = prepare_params(weight, bias)   # hoisted to parameter-load time

    # 1) Small batch -> single full-dims block, unpadded 16-wide output.
    x1 = jax.random.normal(k_x, (8, input_size), dtype=jnp.float32)
    out1 = jax.block_until_ready(aux_regressor_linear(x1, w_t, b_row))
    ref1 = _reference(x1, weight, bias)
    assert out1.shape == (8, output_size)
    assert jnp.allclose(out1, ref1, atol=1e-5, rtol=1e-5), "mismatch (single block)"

    # 2) Divisible multi-tile batch: grid=(3,), W/b stay VMEM-resident across steps.
    x2 = jax.random.normal(k_x2, (48, input_size), dtype=jnp.float32)
    out2 = jax.block_until_ready(
        aux_regressor_linear(x2, w_t, b_row, block_b=16, min_grid_steps=1))
    ref2 = _reference(x2, weight, bias)
    assert out2.shape == (48, output_size)
    assert jnp.allclose(out2, ref2, atol=1e-5, rtol=1e-5), "mismatch (tiled)"

    # 3) Ragged batch with forced >=2-step main grid (v7x path): 37 = 2*16 + tail of 5.
    x3 = jax.random.normal(k_x3, (37, input_size), dtype=jnp.float32)
    out3 = jax.block_until_ready(
        aux_regressor_linear(x3, w_t, b_row, block_b=16, min_grid_steps=2))
    ref3 = _reference(x3, weight, bias)
    assert out3.shape == (37, output_size)
    assert jnp.allclose(out3, ref3, atol=1e-5, rtol=1e-5), "mismatch (ragged tail)"

    # 4) bf16 output (halves writeback bytes); epilogue stays f32, looser tolerance.
    out4 = jax.block_until_ready(
        aux_regressor_linear(x1, w_t, b_row, out_dtype=jnp.bfloat16))
    assert out4.shape == (8, output_size)
    assert jnp.allclose(out4.astype(jnp.float32), ref1, atol=1e-2, rtol=1e-2), \
        "mismatch (bf16 output)"

    print("KERNEL_OK")
</pallas_src>

<mosaic_0001>
module attributes {stable_mosaic.version = 11 : i64} {
  func.func @_aux_regressor_kernel(%arg0: i32, %arg1: memref<8x32xf32, #tpu.memory_space<vmem>>, %arg2: memref<32x16xf32, #tpu.memory_space<vmem>>, %arg3: memref<1x16xf32, #tpu.memory_space<vmem>>, %arg4: memref<8x16xf32, #tpu.memory_space<vmem>>) attributes {dimension_semantics = [#tpu.dimension_semantics<parallel>], iteration_bounds = array<i64: 1>, scalar_prefetch = 0 : i64, scratch_operands = 0 : i64, tpu.core_type = #tpu.core_type<tc>, window_params = [{transform_indices = @transform_0, window_bounds = array<i64: 8, 32>}, {pipeline_mode = #tpu.pipeline_mode<synchronous>, transform_indices = @transform_1, window_bounds = array<i64: 32, 16>}, {pipeline_mode = #tpu.pipeline_mode<synchronous>, transform_indices = @transform_2, window_bounds = array<i64: 1, 16>}, {transform_indices = @transform_3, window_bounds = array<i64: 8, 16>}]} {
    %c0 = arith.constant 0 : index
    %c0_0 = arith.constant 0 : index
    %0 = vector.load %arg1[%c0, %c0_0] : memref<8x32xf32, #tpu.memory_space<vmem>>, vector<8x32xf32>
    %c0_1 = arith.constant 0 : index
    %c0_2 = arith.constant 0 : index
    %1 = vector.load %arg2[%c0_1, %c0_2] : memref<32x16xf32, #tpu.memory_space<vmem>>, vector<32x16xf32>
    %cst = arith.constant dense<0.000000e+00> : vector<8x16xf32>
    %2 = tpu.matmul %0, %1, %cst {dimension_numbers = #tpu.dot_dimension_numbers<[1], [0], [0], [1], [0, 0, 1, 1], [], []>, precision = #tpu.contract_precision<fp32>} : vector<8x32xf32>, vector<32x16xf32>, vector<8x16xf32> -> vector<8x16xf32>
    %c0_3 = arith.constant 0 : index
    %c0_4 = arith.constant 0 : index
    %3 = vector.load %arg3[%c0_3, %c0_4] : memref<1x16xf32, #tpu.memory_space<vmem>>, vector<1x16xf32>
    %4 = vector.broadcast %3 : vector<1x16xf32> to vector<8x16xf32>
    %5 = arith.addf %2, %4 : vector<8x16xf32>
    %cst_5 = arith.constant 0.000000e+00 : f32
    %cst_6 = arith.constant 1.000000e+00 : f32
    %6 = vector.broadcast %cst_5 : f32 to vector<8x16xf32>
    %7 = arith.maximumf %6, %5 : vector<8x16xf32>
    %8 = vector.broadcast %cst_6 : f32 to vector<8x16xf32>
    %9 = arith.minimumf %8, %7 : vector<8x16xf32>
    %cst_7 = arith.constant dense<0.000000e+00> : vector<8xf32>
    %10 = vector.multi_reduction <add>, %9, %cst_7 [1] : vector<8x16xf32> to vector<8xf32>
    %11 = vector.shape_cast %10 : vector<8xf32> to vector<8x1xf32>
    %cst_8 = arith.constant 9.99999996E-13 : f32
    %12 = vector.broadcast %cst_8 : f32 to vector<8x1xf32>
    %13 = arith.maximumf %11, %12 : vector<8x1xf32>
    %14 = tpu.reciprocal %13 : vector<8x1xf32> -> vector<8x1xf32>
    %15 = vector.broadcast %14 : vector<8x1xf32> to vector<8x16xf32>
    %16 = arith.mulf %9, %15 : vector<8x16xf32>
    %c0_9 = arith.constant 0 : index
    %c0_10 = arith.constant 0 : index
    %17 = vector.load %arg4[%c0_9, %c0_10] : memref<8x16xf32, #tpu.memory_space<vmem>>, vector<8x16xf32>
    tpu.vector_store %arg4[%c0_9, %c0_10], %16 {strides = array<i32>} : memref<8x16xf32, #tpu.memory_space<vmem>>, vector<8x16xf32>,
    return
  }
  func.func @transform_0(%arg0: i32) -> (i32, i32) {
    %c0_i32 = arith.constant 0 : i32
    %c0_i32_0 = arith.constant 0 : i32
    return %arg0, %c0_i32 : i32, i32
  }
  func.func @transform_1(%arg0: i32) -> (i32, i32) {
    %c0_i32 = arith.constant 0 : i32
    %c0_i32_0 = arith.constant 0 : i32
    %c0_i32_1 = arith.constant 0 : i32
    return %c0_i32, %c0_i32_0 : i32, i32
  }
  func.func @transform_2(%arg0: i32) -> (i32, i32) {
    %c0_i32 = arith.constant 0 : i32
    %c0_i32_0 = arith.constant 0 : i32
    %c0_i32_1 = arith.constant 0 : i32
    return %c0_i32, %c0_i32_0 : i32, i32
  }
  func.func @transform_3(%arg0: i32) -> (i32, i32) {
    %c0_i32 = arith.constant 0 : i32
    %c0_i32_0 = arith.constant 0 : i32
    return %arg0, %c0_i32 : i32, i32
  }
}

</mosaic_0001>

<bundles_post_ra>
// kernel: tpu_custom_call.1
= control target key start
LH: loop header
LB: loop body
LE: loop exit
PB: predicated region body
PF: predicated region fallthrough
CT: control target
= control target key end

     0   :  { %v713_v3 = vmov 0.0|0.0   ;;  %vm27_vm0 = vcmask 261120   ;;  %vm714_vm1 = vmmov 0   ;;  %v715_v10 = vmov 0.0   ;;  %s785_s0 = inlined_call_operand.vmem [shape: f32[8,32], index: 0, kind: input, shape index: {}]   ;;  %s786_s1 = inlined_call_operand.vmem [shape: f32[32,16], index: 1, kind: input, shape index: {}]   ;;  %s787_s2 = inlined_call_operand.vmem [shape: f32[1,16], index: 2, kind: input, shape index: {}]   ;;  %s788_s3 = inlined_call_operand.hbm [shape: f32[8,16], index: 3, kind: output, shape index: {}]  }
   0x1   :  { %v16_v0 = vld [vmem:[%s786_s1] sm:$0xff]  ;;  %v17_v1 = vld [vmem:[%s786_s1 + $0x8] sm:$0xff]  ;;  %v18_v2 = vld [vmem:[%s786_s1 + $0x10] sm:$0xff]  ;;  %637 = vmatprep.subr.bf16.mxu1 %v713_v3  ;;  %655 = vmatprep.subr.bf16.mxu0 %v713_v3 }
   0x2   :  { %v32_v4 = vand.u32 4294901760, %v16_v0  ;;  %v35_v5 = vand.u32 4294901760, %v17_v1  ;;  %v19_v6 = vld [vmem:[%s786_s1 + $0x18] sm:$0xff]  ;;  %v38_v7 = vand.u32 4294901760, %v18_v2  ;;  %v15_v8 = vld [vmem:[%s785_s0] sm:$0xff]  ;;  %579 = vmatprep.mubr.msk.f32.mxu1 %vm714_vm1, %v715_v10  ;;  %612 = vmatprep.mubr.msk.f32.mxu0 %vm714_vm1, %v715_v10 }
   0x3   :  { %v41_v9 = vand.u32 4294901760, %v19_v6  ;;  %v29_v11 = vsel %vm27_vm0, %v15_v8, 0 }
   0x4   :  { %8 = vsyncpa [#allocation3], 0  ;;  %v638_v12 = vpack.c.bf16 %v35_v5, %v32_v4  ;;  %v112_v13 = vsub.f32 %v16_v0, %v32_v4  ;;  %v119_v14 = vsub.f32 %v17_v1, %v35_v5  ;;  %v126_v15 = vsub.f32 %v18_v2, %v38_v7  ;;  %v540_v41 = vld [vmem:[%s787_s2] ss:$0 sm:$0xff]  ;;  %s716_s22 = smov [#allocation2]  }
   0x5   :  { %v133_v16 = vsub.f32 %v19_v6, %v41_v9  ;;  %v100_v17 = vand.u32 4294901760, %v29_v11  ;;  %v641_v18 = vpack.c.bf16 %v41_v9, %v38_v7  ;;  %vm518_vm2 = vcmask 130048   ;;  %s532_s23 = sshll.u32 %s716_s22, 4  ;;  %s533_s23 = int_to_ptr.vmem [resolvable:$true] %s532_s23 }
   0x6   :  { %639 = vmatpush3.bf16.msra.mxu1 %v638_v12  ;;  %657 = vmatpush3.bf16.msra.mxu0 %v638_v12  ;;  %v113_v19 = vand.u32 4294901760, %v112_v13  ;;  %v120_v20 = vand.u32 4294901760, %v119_v14  ;;  %v127_v21 = vand.u32 4294901760, %v126_v15  ;;  %v650_v39 = vpack.c.bf16 %v119_v14, %v112_v13  ;;  %s689_s2 = scalar_lea.vmem %s533_s23, 128  ;;  %p694_p1 = scmp.lt.s32.totalorder %s533_s23, %s533_s23 }
   0x7   :  { %640 = vmatprep.subr.bf16.mxu1 %v713_v3  ;;  %658 = vmatprep.subr.bf16.mxu0 %v713_v3  ;;  %v101_v22 = vsub.f32 %v29_v11, %v100_v17  ;;  %v134_v23 = vand.u32 4294901760, %v133_v16  ;;  %v653_v40 = vpack.c.bf16 %v133_v16, %v126_v15  ;;  %p690_p0 = scmp.ne.s32.totalorder %s533_s23, %s689_s2  ;;  %p695_p2 = scmp.lt.s32.totalorder %s689_s2, %s689_s2 }
   0x8   :  { %v114_v24 = vsub.f32 %v112_v13, %v113_v19  ;;  %v121_v25 = vsub.f32 %v119_v14, %v120_v20  ;;  %v128_v26 = vsub.f32 %v126_v15, %v127_v21  ;;  %v662_v31 = vpack.c.bf16 %v120_v20, %v113_v19 }
   0x9   :  { %v102_v27 = vand.u32 4294901760, %v101_v22  ;;  %v135_v28 = vsub.f32 %v133_v16, %v134_v23  ;;  %v665_v37 = vpack.c.bf16 %v134_v23, %v127_v21  ;;  %p696_p3 = por %p695_p2, %p694_p1 }
   0xa   :  { %642 = vmatpush3.bf16.msra.mxu1 %v641_v18  ;;  %660 = vmatpush3.bf16.msra.mxu0 %v641_v18  ;;  %v115_v29 = vand.u32 4294901760, %v114_v24  ;;  %v122_v30 = vand.u32 4294901760, %v121_v25  ;;  %v129_v34 = vand.u32 4294901760, %v128_v26 }
   0xb   :  { %v103_v32 = vsub.f32 %v101_v22, %v102_v27  ;;  %643 = vmatprep.subr.bf16.mxu1 %v713_v3  ;;  %661 = vmatprep.subr.bf16.mxu0 %v713_v3  ;;  %v136_v35 = vand.u32 4294901760, %v135_v28  ;;  %p697_p4 = pnand %p696_p3, %p690_p0 }
   0xc   :  { %v644_v33 = vpack.c.bf16 %v122_v30, %v115_v29 }
   0xd   :  { %v104_v36 = vand.u32 4294901760, %v103_v32  ;;  %613 = vmatmul.mubr.f32.vlgmr.msra.gmra.mrb[0].mxu0 %v102_v27  ;;  %v647_v38 = vpack.c.bf16 %v136_v35, %v129_v34 }
   0xe   :  { %663 = vmatpush3.bf16.msra.mxu0 %v662_v31  ;;  %623 = vmatprep.mubr.msk.f32.mxu0 %vm714_vm1, %v715_v10 }
   0xf   :  { %580 = vmatmul.mubr.f32.vlgmr.msra.gmra.mrb[0].mxu1 %v104_v36  ;;  %664 = vmatprep.subr.bf16.mxu0 %v713_v3 }
  0x10   :  { %645 = vmatpush3.bf16.msra.mxu1 %v644_v33  ;;  %590 = vmatprep.mubr.msk.f32.mxu1 %vm714_vm1, %v715_v10 }
  0x11   :  { %646 = vmatprep.subr.bf16.mxu1 %v713_v3 }
  0x12   :  { %666 = vmatpush3.bf16.msra.mxu0 %v665_v37 }
  0x13   :  { %667 = vmatprep.subr.bf16.mxu0 %v713_v3 }
  0x14   :  { %648 = vmatpush3.bf16.msra.mxu1 %v647_v38 }
  0x15   :  { %649 = vmatprep.subr.bf16.mxu1 %v713_v3  ;;  %624 = vmatmul.mubr.f32.vlgmr.msra.gmra.mrb[0].mxu0 %v100_v17 }
  0x16   :  { %669 = vmatpush3.bf16.msra.mxu0 %v638_v12  ;;  %634 = vmatprep.mubr.msk.f32.mxu0 %vm714_vm1, %v715_v10 }
  0x17   :  { %591 = vmatmul.mubr.f32.vlgmr.msra.gmra.mrb[0].mxu1 %v100_v17  ;;  %670 = vmatprep.subr.bf16.mxu0 %v713_v3 }
  0x18   :  { %651 = vmatpush3.bf16.msra.mxu1 %v650_v39  ;;  %601 = vmatprep.mubr.msk.f32.mxu1 %vm714_vm1, %v715_v10 }
  0x19   :  { %652 = vmatprep.subr.bf16.mxu1 %v713_v3 }
  0x1a   :  { %672 = vmatpush3.bf16.msra.mxu0 %v641_v18 }
  0x1c   :  { %654 = vmatpush3.bf16.msra.mxu1 %v653_v40 }
  0x1d   :  { %635 = vmatmul.mubr.f32.vlgmr.msra.gmra.mrb[0].mxu0 %v100_v17 }
  0x1f   :  { %602 = vmatmul.mubr.f32.vlgmr.msra.gmra.mrb[0].mxu1 %v101_v22 }
  0xf0   :  { %v512_v42 = vpop.f32.mrb[0].mxu0 }
  0xf1   :  { %v636_v43 = vpop.f32.mrb[1].mxu0 }
  0xf2   :  { %v277_v44 = vpop.f32.mrb[0].mxu1 }
  0xf3   :  { %v673_v45 = vadd.f32 %v540_v41, %v277_v44  ;;  %v603_v46 = vpop.f32.mrb[1].mxu1 }
  0xf5   :  { %v674_v47 = vadd.f32 %v673_v45, %v512_v42 }
  0xf7   :  { %v516_v48 = vmax.f32 %v674_v47, 0.0 }
  0xf9   :  { %v517_v49 = vmin.f32 %v516_v48, 1.0 }
  0xfb   :  { %v519_v50 = vsel %vm518_vm2, %v517_v49, 0.0 }
  0xfc   :  { %520 = vadd.xlane.f32.xlu0 %v519_v50 }
 0x189   :  { %v521_v51 = vpop.xlane.xlu0 %520 }
 0x18a   :  { %v522_v52 = vmax.f32 %v521_v51, 1e-12 }
 0x18c   :  { %687 = vrcp.f32 %v522_v52 }
 0x196   :  { %v688_v53 = vpop.eup %687 }
 0x197   :  { %v524_v54 = vmul.f32 %v688_v53, %v517_v49 }
 0x199   :  { %525 = vst.msk [vmem:[#allocation2] sm:$0xff] %vm518_vm2, %v524_v54 }
 0x19a   :  { %700 = shalt.err (!%p697_p4)
}
 0x19b   :  { %s701_s26 = scalar_lea.hbm %s788_s3, 128 }
 0x19c   :  { %p702_p5 = scmp.ne.s32.totalorder %s788_s3, %s701_s26  ;;  %p705_p6 = scmp.lt.u32.totalorder %s701_s26, %s788_s3 }
 0x19e   :  { %p707_p7 = pnand %p705_p6, %p702_p5 }
 0x1a0   :  { %710 = shalt.err (!%p707_p7)
}
 0x1a1   :  { %535 = dma.vmem_to_hbm [thread:$0]  %s533_s23, 128, %s788_s3, [#allocation3]  }
 0x1a2   :  { %711 = dma.done.wait [#allocation3], 128  }
 0x1a3   :  { %712 = vsyncadd [#allocation3], 4294967168 }
 0x1a4   :  { %539 = vsyncpa [#allocation3], 1 }

</bundles_post_ra>
